<compile_context>
chip_gen: v5e
topology: v5e:2x2
jax: 0.10.0
libtpu: 0.0.40
codegen_flags: <defaults>
</compile_context>

<pallas_src>
import functools
import numpy as np
import jax
import jax.numpy as jnp
from jax.experimental import pallas as pl
from jax.experimental.pallas import tpu as pltpu


# ---------------------------------------------------------------------------
# Schedule construction (plain numpy glue — mirrors DDPM.register_schedule)
# ---------------------------------------------------------------------------
def build_schedule(timesteps=1000, linear_start=0.0015, linear_end=0.0195,
                   v_posterior=0.0):
    # 'linear' beta schedule (float64, like torch.linspace(...)**2)
    betas = np.linspace(linear_start ** 0.5, linear_end ** 0.5, timesteps,
                        dtype=np.float64) ** 2
    alphas = 1.0 - betas
    alphas_cumprod = np.cumprod(alphas, axis=0)
    alphas_cumprod_prev = np.append(1.0, alphas_cumprod[:-1])
    posterior_variance = ((1 - v_posterior) * betas *
                          (1.0 - alphas_cumprod_prev) / (1.0 - alphas_cumprod)
                          + v_posterior * betas)
    # eps-parameterization lvlb weights
    lvlb_weights = betas ** 2 / (2 * posterior_variance * alphas
                                 * (1 - alphas_cumprod))
    lvlb_weights[0] = lvlb_weights[1]
    sched = {
        "betas": betas,
        "sqrt_alphas_cumprod": np.sqrt(alphas_cumprod),
        "sqrt_one_minus_alphas_cumprod": np.sqrt(1.0 - alphas_cumprod),
        "lvlb_weights": lvlb_weights,
    }
    return {k: jnp.asarray(v, jnp.float32) for k, v in sched.items()}


def timestep_embedding(t, dim):
    """Standard sinusoidal embedding of the integer timesteps, shape (B, dim)."""
    half = dim // 2
    freqs = jnp.exp(-np.log(10000.0) *
                    jnp.arange(half, dtype=jnp.float32) / half)
    args = t.astype(jnp.float32)[:, None] * freqs[None, :]
    return jnp.concatenate([jnp.sin(args), jnp.cos(args)], axis=-1)


# ---------------------------------------------------------------------------
# Pallas kernel: whole-batch q_sample + denoiser + fused MSE / loss reductions
# ---------------------------------------------------------------------------
def ddpm_p_losses_kernel(x_ref, noise_ref, sa_ref, s1ma_ref, tproj_ref,
                         w_ref, sel_ref, wvec_ref,
                         per_batch_ref, scalars_ref, *, inv_cl):
    x = x_ref[...]            # (Rp, Lp) f32, rows = flattened (batch, channel)
    noise = noise_ref[...]    # (Rp, Lp) f32

    # q_sample: sqrt(alphas_cumprod)*x_start + sqrt(1-alphas_cumprod)*noise
    x_noisy = sa_ref[...] * x + s1ma_ref[...] * noise                # (Rp, Lp)

    # synthetic denoiser: bf16 MXU matmul (f32 accumulate) + hoisted time/bias
    model_out = jnp.dot(x_noisy.astype(jnp.bfloat16), w_ref[...],
                        preferred_element_type=jnp.float32) + tproj_ref[...]

    # eps parameterization: target = noise; squared error
    diff = model_out - noise
    d2 = diff * diff                                                 # (Rp, Lp)

    # group squared errors per batch: (B, Rp) selection @ (Rp, Lp) -> (B, Lp)
    grouped = jnp.dot(sel_ref[...], d2, preferred_element_type=jnp.float32)
    per_batch_ref[...] = jnp.sum(grouped, axis=-1, keepdims=True) * inv_cl  # (B,1)

    # fused scalar reductions (lane-dense intermediate):
    #   wvec row 0 = 1/B        -> mean(per-batch MSE)      (loss_simple)
    #   wvec row 1 = lvlb[t]/B  -> mean(lvlb * per-batch)   (loss_vlb)
    weighted = jnp.dot(wvec_ref[...], grouped,
                       preferred_element_type=jnp.float32)               # (2, Lp)
    scalars_ref[...] = jnp.sum(weighted, axis=-1, keepdims=True) * inv_cl  # (2, 1)


def _pad2(a, rows, cols):
    return jnp.pad(a, ((0, rows - a.shape[0]), (0, cols - a.shape[1])))


def ddpm_p_losses(x, noise, t, t_emb, W, Wt, bias, sched,
                  l_simple_weight=1.0, original_elbo_weight=0.0):
    B, C, L = x.shape
    R = B * C
    Rp = -(-R // 8) * 8            # sublane multiple
    Lp = -(-L // 128) * 128        # lane multiple

    # extract_into_tensor gathers (tiny glue, stays in JAX)
    sa = sched["sqrt_alphas_cumprod"][t]                  # (B,)
    s1ma = sched["sqrt_one_minus_alphas_cumprod"][t]      # (B,)
    lvlb = sched["lvlb_weights"][t]                       # (B,)

    # flatten batch*channel onto the sublane axis; zero-pad to (Rp, Lp)
    x2d = _pad2(x.reshape(R, L), Rp, Lp)
    n2d = _pad2(noise.reshape(R, L), Rp, Lp)

    # hoisted time-embedding projection + bias, broadcast over channels
    tproj = jnp.repeat(t_emb @ Wt + bias, C, axis=0)      # (R, L)
    tproj = _pad2(tproj, Rp, Lp)

    sa_col = _pad2(jnp.repeat(sa, C)[:, None], Rp, 1)     # (Rp, 1)
    s1ma_col = _pad2(jnp.repeat(s1ma, C)[:, None], Rp, 1)

    w_p = _pad2(W.astype(jnp.bfloat16), Lp, Lp)           # bf16 weights

    # per-batch row-selection matrix and scalar-reduction weights
    sel = _pad2(jnp.repeat(jnp.eye(B, dtype=jnp.float32), C, axis=1), B, Rp)  # (B, Rp)
    wvec = jnp.stack([jnp.full((B,), 1.0 / B, jnp.float32),
                      lvlb.astype(jnp.float32) * (1.0 / B)], axis=0)          # (2, B)

    inv_cl = 1.0 / float(C * L)

    flops = int(2 * Rp * Lp * Lp + 2 * B * Rp * Lp + 2 * 2 * B * Lp + 6 * Rp * Lp)
    bytes_in = (x2d.size + n2d.size + tproj.size + sa_col.size + s1ma_col.size
                + sel.size + wvec.size) * 4 + w_p.size * 2
    bytes_out = (B + 2) * 4
    cost = pl.CostEstimate(flops=flops, transcendentals=0,
                           bytes_accessed=int(bytes_in + bytes_out))

    vmem = pl.BlockSpec(memory_space=pltpu.MemorySpace.VMEM)
    per_batch, scalars = pl.pallas_call(
        functools.partial(ddpm_p_losses_kernel, inv_cl=inv_cl),
        out_shape=(jax.ShapeDtypeStruct((B, 1), jnp.float32),
                   jax.ShapeDtypeStruct((2, 1), jnp.float32)),
        in_specs=[vmem] * 8,
        out_specs=(vmem, vmem),
        cost_estimate=cost,
    )(x2d, n2d, sa_col, s1ma_col, tproj, w_p, sel, wvec)

    loss_per_batch = per_batch[:, 0]          # (B,)
    loss_simple_mean = scalars[0, 0]          # == loss_per_batch.mean()
    loss_vlb = scalars[1, 0]                  # == (lvlb_weights[t]*loss).mean()
    loss_simple = loss_simple_mean * l_simple_weight
    loss = loss_simple + original_elbo_weight * loss_vlb
    # TODO(synk): only loss_type='l2' / parameterization='eps' are implemented.
    loss_dict = {"train/loss_simple": loss_simple_mean,
                 "train/loss_vlb": loss_vlb,
                 "train/loss": loss}
    return loss, loss_dict, loss_per_batch


# ---------------------------------------------------------------------------
if __name__ == "__main__":
    # L = ae_emb_dim chosen lane-dense (128); B*C = 8 fills one sublane group.
    B, C, L, D_EMB, T = 2, 4, 128, 32, 1000

    key = jax.random.PRNGKey(0)
    kx, kn, kt, kw, kwt, kb = jax.random.split(key, 6)

    x = jax.random.normal(kx, (B, C, L), jnp.float32)
    noise = jax.random.normal(kn, (B, C, L), jnp.float32)   # randn_like
    t = jax.random.randint(kt, (B,), 0, T)                   # forward(): randint(0,T,(B,))

    # TODO(synk): the real `self.model` is an external UNet/denoiser; it is
    # synthesized here as a deterministic linear model x @ W + bias + t_emb @ Wt.
    W = jax.random.normal(kw, (L, L), jnp.float32) * 0.05
    Wt = jax.random.normal(kwt, (D_EMB, L), jnp.float32) * 0.05
    bias = jax.random.normal(kb, (1, L), jnp.float32) * 0.05

    sched = build_schedule(timesteps=T)
    t_emb = timestep_embedding(t, D_EMB)

    run = jax.jit(ddpm_p_losses)
    loss, loss_dict, loss_per_batch = run(x, noise, t, t_emb, W, Wt, bias, sched)
    loss = jax.block_until_ready(loss)
    loss_per_batch = jax.block_until_ready(loss_per_batch)

    # pure-JAX reference (same bf16-input / f32-accumulate matmul semantics)
    sa = sched["sqrt_alphas_cumprod"][t][:, None, None]
    s1ma = sched["sqrt_one_minus_alphas_cumprod"][t][:, None, None]
    x_noisy = sa * x + s1ma * noise
    model_out = (jnp.einsum("bcl,lm->bcm",
                            x_noisy.astype(jnp.bfloat16),
                            W.astype(jnp.bfloat16),
                            preferred_element_type=jnp.float32)
                 + bias[None] + (t_emb @ Wt)[:, None, :])
    ref_pb = ((model_out - noise) ** 2).mean(axis=(1, 2))
    ref_simple = ref_pb.mean()
    ref_vlb = (sched["lvlb_weights"][t] * ref_pb).mean()
    ref_loss = ref_simple * 1.0 + 0.0 * ref_vlb

    np.testing.assert_allclose(np.asarray(loss_per_batch), np.asarray(ref_pb),
                               rtol=1e-2, atol=1e-3)
    np.testing.assert_allclose(float(loss_dict["train/loss_vlb"]), float(ref_vlb),
                               rtol=1e-2, atol=1e-3)
    np.testing.assert_allclose(float(loss), float(ref_loss),
                               rtol=1e-2, atol=1e-3)

    print("KERNEL_OK")
</pallas_src>

<mosaic_0001>
module attributes {stable_mosaic.version = 11 : i64} {
  func.func @ddpm_p_losses_kernel(%arg0: memref<8x128xf32, #tpu.memory_space<vmem>>, %arg1: memref<8x128xf32, #tpu.memory_space<vmem>>, %arg2: memref<8x1xf32, #tpu.memory_space<vmem>>, %arg3: memref<8x1xf32, #tpu.memory_space<vmem>>, %arg4: memref<8x128xf32, #tpu.memory_space<vmem>>, %arg5: memref<128x128xbf16, #tpu.memory_space<vmem>>, %arg6: memref<2x8xf32, #tpu.memory_space<vmem>>, %arg7: memref<2x2xf32, #tpu.memory_space<vmem>>, %arg8: memref<2x1xf32, #tpu.memory_space<vmem>>, %arg9: memref<2x1xf32, #tpu.memory_space<vmem>>) attributes {dimension_semantics = [], scalar_prefetch = 0 : i64, scratch_operands = 0 : i64, tpu.core_type = #tpu.core_type<tc>} {
    %c0 = arith.constant 0 : index
    %c0_0 = arith.constant 0 : index
    %0 = vector.load %arg0[%c0, %c0_0] : memref<8x128xf32, #tpu.memory_space<vmem>>, vector<8x128xf32>
    %c0_1 = arith.constant 0 : index
    %c0_2 = arith.constant 0 : index
    %1 = vector.load %arg1[%c0_1, %c0_2] : memref<8x128xf32, #tpu.memory_space<vmem>>, vector<8x128xf32>
    %c0_3 = arith.constant 0 : index
    %c0_4 = arith.constant 0 : index
    %2 = vector.load %arg2[%c0_3, %c0_4] : memref<8x1xf32, #tpu.memory_space<vmem>>, vector<8x1xf32>
    %3 = vector.broadcast %2 : vector<8x1xf32> to vector<8x128xf32>
    %4 = arith.mulf %3, %0 : vector<8x128xf32>
    %c0_5 = arith.constant 0 : index
    %c0_6 = arith.constant 0 : index
    %5 = vector.load %arg3[%c0_5, %c0_6] : memref<8x1xf32, #tpu.memory_space<vmem>>, vector<8x1xf32>
    %6 = vector.broadcast %5 : vector<8x1xf32> to vector<8x128xf32>
    %7 = arith.mulf %6, %1 : vector<8x128xf32>
    %8 = arith.addf %4, %7 : vector<8x128xf32>
    %9 = arith.truncf %8 : vector<8x128xf32> to vector<8x128xbf16>
    %c0_7 = arith.constant 0 : index
    %c0_8 = arith.constant 0 : index
    %10 = vector.load %arg5[%c0_7, %c0_8] : memref<128x128xbf16, #tpu.memory_space<vmem>>, vector<128x128xbf16>
    %cst = arith.constant dense<0.000000e+00> : vector<8x128xf32>
    %11 = tpu.matmul %9, %10, %cst {dimension_numbers = #tpu.dot_dimension_numbers<[1], [0], [0], [1], [0, 0, 1, 1], [], []>} : vector<8x128xbf16>, vector<128x128xbf16>, vector<8x128xf32> -> vector<8x128xf32>
    %c0_9 = arith.constant 0 : index
    %c0_10 = arith.constant 0 : index
    %12 = vector.load %arg4[%c0_9, %c0_10] : memref<8x128xf32, #tpu.memory_space<vmem>>, vector<8x128xf32>
    %13 = arith.addf %11, %12 : vector<8x128xf32>
    %14 = arith.subf %13, %1 : vector<8x128xf32>
    %15 = arith.mulf %14, %14 : vector<8x128xf32>
    %c0_11 = arith.constant 0 : index
    %c0_12 = arith.constant 0 : index
    %16 = vector.load %arg6[%c0_11, %c0_12] : memref<2x8xf32, #tpu.memory_space<vmem>>, vector<2x8xf32>
    %cst_13 = arith.constant dense<0.000000e+00> : vector<2x128xf32>
    %17 = tpu.matmul %16, %15, %cst_13 {dimension_numbers = #tpu.dot_dimension_numbers<[1], [0], [0], [1], [0, 0, 1, 1], [], []>} : vector<2x8xf32>, vector<8x128xf32>, vector<2x128xf32> -> vector<2x128xf32>
    %cst_14 = arith.constant dense<0.000000e+00> : vector<2xf32>
    %18 = vector.multi_reduction <add>, %17, %cst_14 [1] : vector<2x128xf32> to vector<2xf32>
    %19 = vector.shape_cast %18 : vector<2xf32> to vector<2x1xf32>
    %cst_15 = arith.constant 0.001953125 : f32
    %20 = vector.broadcast %cst_15 : f32 to vector<2x1xf32>
    %21 = arith.mulf %19, %20 : vector<2x1xf32>
    %c0_16 = arith.constant 0 : index
    %c0_17 = arith.constant 0 : index
    %22 = vector.load %arg8[%c0_16, %c0_17] : memref<2x1xf32, #tpu.memory_space<vmem>>, vector<2x1xf32>
    tpu.vector_store %arg8[%c0_16, %c0_17], %21 {strides = array<i32>} : memref<2x1xf32, #tpu.memory_space<vmem>>, vector<2x1xf32>,
    %c0_18 = arith.constant 0 : index
    %c0_19 = arith.constant 0 : index
    %23 = vector.load %arg7[%c0_18, %c0_19] : memref<2x2xf32, #tpu.memory_space<vmem>>, vector<2x2xf32>
    %cst_20 = arith.constant dense<0.000000e+00> : vector<2x128xf32>
    %24 = tpu.matmul %23, %17, %cst_20 {dimension_numbers = #tpu.dot_dimension_numbers<[1], [0], [0], [1], [0, 0, 1, 1], [], []>} : vector<2x2xf32>, vector<2x128xf32>, vector<2x128xf32> -> vector<2x128xf32>
    %cst_21 = arith.constant dense<0.000000e+00> : vector<2xf32>
    %25 = vector.multi_reduction <add>, %24, %cst_21 [1] : vector<2x128xf32> to vector<2xf32>
    %26 = vector.shape_cast %25 : vector<2xf32> to vector<2x1xf32>
    %cst_22 = arith.constant 0.001953125 : f32
    %27 = vector.broadcast %cst_22 : f32 to vector<2x1xf32>
    %28 = arith.mulf %26, %27 : vector<2x1xf32>
    %c0_23 = arith.constant 0 : index
    %c0_24 = arith.constant 0 : index
    %29 = vector.load %arg9[%c0_23, %c0_24] : memref<2x1xf32, #tpu.memory_space<vmem>>, vector<2x1xf32>
    tpu.vector_store %arg9[%c0_23, %c0_24], %28 {strides = array<i32>} : memref<2x1xf32, #tpu.memory_space<vmem>>, vector<2x1xf32>,
    return
  }
}

</mosaic_0001>

<bundles_post_ra>
// kernel: ddpm_p_losses.1
= control target key start
LH: loop header
LB: loop body
LE: loop exit
PB: predicated region body
PF: predicated region fallthrough
CT: control target
= control target key end

     0   :  { %v247_v0 = vmov 0   ;;  %vm130_vm0 = vcmask 64512   ;;  %vm154_vm1 = vcmask 1041408   ;;  %vm162_vm2 = vcmask 15360   ;;  %s349_s2 = inlined_call_operand.vmem [shape: f32[8,1], index: 2, kind: input, shape index: {}]   ;;  %s350_s5 = inlined_call_operand.vmem [shape: bf16[128,128], index: 5, kind: input, shape index: {}]   ;;  %s351_s3 = inlined_call_operand.vmem [shape: f32[8,1], index: 3, kind: input, shape index: {}]   ;;  %s352_s0 = inlined_call_operand.vmem [shape: f32[8,128], index: 0, kind: input, shape index: {}]   ;;  %s353_s1 = inlined_call_operand.vmem [shape: f32[8,128], index: 1, kind: input, shape index: {}]   ;;  %s354_s4 = inlined_call_operand.vmem [shape: f32[8,128], index: 4, kind: input, shape index: {}]   ;;  %s355_s6 = inlined_call_operand.vmem [shape: f32[2,8], index: 6, kind: input, shape index: {}]   ;;  %s356_s7 = inlined_call_operand.vmem [shape: f32[2,2], index: 7, kind: input, shape index: {}]   ;;  %s357_s8 = inlined_call_operand.vmem [shape: f32[2,1], index: 8, kind: output, shape index: {0}]   ;;  %s358_s9 = inlined_call_operand.vmem [shape: f32[2,1], index: 9, kind: output, shape index: {1}]  }
   0x1   :  { %246 = vset.pattern.permute.xlu0 %v247_v0  ;;  %v33_v1 = vld [vmem:[%s349_s2] sm:$0xff]  ;;  %v244_v2 = vld [vmem:[%s350_s5 + $0x38] sm:$0xff]  ;;  %v243_v3 = vld [vmem:[%s350_s5 + $0x30] sm:$0xff]  ;;  %vm159_vm3 = vcmask 1024  }
   0x2   :  { %36 = vperm.xlu0 %246, %v33_v1   ;;  %114 = vmatpush.bf16.msra.mxu0 %v244_v2  ;;  %v40_v4 = vld [vmem:[%s351_s3] sm:$0xff]  ;;  %v242_v5 = vld [vmem:[%s350_s5 + $0x28] sm:$0xff]  ;;  %v240_v7 = vld [vmem:[%s350_s5 + $0x18] sm:$0xff] }
   0x3   :  { %v241_v6 = vld [vmem:[%s350_s5 + $0x20] sm:$0xff]  ;;  %v239_v8 = vld [vmem:[%s350_s5 + $0x10] sm:$0xff]  ;;  %v238_v9 = vld [vmem:[%s350_s5 + $0x8] sm:$0xff] }
   0x4   :  { %v237_v10 = vld [vmem:[%s350_s5] sm:$0xff] }
   0x5   :  { %v31_v12 = vld [vmem:[%s352_s0] sm:$0xff] }
   0x6   :  { %115 = vmatpush.bf16.msra.mxu0 %v243_v3  ;;  %v32_v13 = vld [vmem:[%s353_s1] sm:$0xff] }
   0x7   :  { %v65_v19 = vld [vmem:[%s354_s4] sm:$0xff] }
   0x8   :  { %v129_v24 = vld [vmem:[%s355_s6] sm:$0x3] }
   0x9   :  { %v161_v26 = vld [vmem:[%s356_s7] sm:$0x3] }
   0xa   :  { %43 = vperm.xlu0 %246, %v40_v4   ;;  %116 = vmatpush.bf16.msra.mxu0 %v242_v5 }
   0xe   :  { %117 = vmatpush.bf16.msra.mxu0 %v241_v6 }
  0x12   :  { %118 = vmatpush.bf16.msra.mxu0 %v240_v7 }
  0x16   :  { %119 = vmatpush.bf16.msra.mxu0 %v239_v8 }
  0x1a   :  { %120 = vmatpush.bf16.msra.mxu0 %v238_v9 }
  0x1e   :  { %121 = vmatpush.bf16.msra.mxu0 %v237_v10 }
  0x74   :  { %v37_v11 = vpop.permute.xlu0 %36 }
  0x75   :  { %v39_v15 = vmul.f32 %v37_v11, %v31_v12 }
  0x7c   :  { %v44_v14 = vpop.permute.xlu0 %43 }
  0x7d   :  { %v46_v16 = vmul.f32 %v44_v14, %v32_v13 }
  0x7f   :  { %v47_v17 = vadd.f32 %v46_v16, %v39_v15 }
  0x81   :  { %v48_v18 = vpack.c.bf16 %v47_v17, %v47_v17 }
  0x83   :  { %122 = vmatmul.bf16.vlgmr.msra.gmra.mxu0 %v48_v18 }
 0x100   :  { %v123_v20 = vpop.f32.mrf.mxu0 }
 0x101   :  { %v124_v21 = vadd.f32 %v123_v20, %v65_v19 }
 0x103   :  { %v127_v22 = vsub.f32 %v124_v21, %v32_v13 }
 0x105   :  { %v128_v23 = vmul.f32 %v127_v22, %v127_v22 }
 0x107   :  { %149 = vmatpush.msra.mxu1 %v128_v23 }
 0x108   :  { %v125_v25 = vpop.f32.mrf.mxu0  ;;  %234 = vmatmul.msk.f32.vlgmr.msra.gmra.mxu1 %vm130_vm0, %v129_v24 }
 0x185   :  { %v151_v27 = vpop.f32.mrf.mxu1 }
 0x186   :  { %235 = vmatpush.msk.msra.mxu2 %vm154_vm1, %v151_v27  ;;  %v155_v28 = vsel %vm154_vm1, %v151_v27, 0.0 }
 0x187   :  { %236 = vmatmul.msk.f32.vlgmr.msra.gmra.mxu2 %vm162_vm2, %v161_v26  ;;  %156 = vadd.xlane.f32.xlu1 %v155_v28 }
 0x1fa   :  { %v157_v29 = vpop.xlane.xlu1 %156 }
 0x1fb   :  { %v158_v30 = vmul.f32 0.001953125, %v157_v29 }
 0x1fd   :  { %160 = vst.msk [vmem:[%s357_s8] sm:$0x3] %vm159_vm3, %v158_v30 }
 0x20a   :  { %v186_v31 = vpop.f32.mrf.mxu2 }
 0x20b   :  { %v189_v32 = vsel %vm154_vm1, %v186_v31, 0.0 }
 0x20c   :  { %190 = vadd.xlane.f32.xlu1 %v189_v32 }
 0x27f   :  { %v191_v33 = vpop.xlane.xlu1 %190 }
 0x280   :  { %v192_v34 = vmul.f32 0.001953125, %v191_v33 }
 0x282   :  { %193 = vst.msk [vmem:[%s358_s9] sm:$0x3] %vm159_vm3, %v192_v34 }

</bundles_post_ra>
